<compile_context>
chip_gen: v6e
topology: v6e:2x2x1
jax: 0.10.0
libtpu: 0.0.40
codegen_flags: <defaults>
</compile_context>

<pallas_src>
import jax
import jax.numpy as jnp
from jax import lax
from jax.experimental import pallas as pl
from jax.experimental.pallas import tpu as pltpu

EPS = 1e-8


def _round_up(v, m):
    return (v + m - 1) // m * m


def _pick_tile(dim, align, cap):
    """Tile size: multiple of `align`, <= cap, minimizing padding of `dim`.

    If the align-rounded dim fits under `cap`, use it whole (single tile, zero
    extra padding). Otherwise scan candidate tiles (largest first), preferring
    zero/minimal padding, with a floor of ~cap/4 to avoid degenerate tiny tiles.
    """
    dim_al = _round_up(dim, align)
    if dim_al <= cap:
        return dim_al
    floor = max(align, (cap // 4) // align * align)
    best_t, best_key = None, None
    t = cap // align * align
    while t >= floor:
        padded = _round_up(dim_al, t)
        key = (padded, -t)          # minimize padding, then maximize tile
        if best_key is None or key < best_key:
            best_key, best_t = key, t
        t -= align
    return best_t


def _cosine_kernel(x_ref, w_ref, o_ref, xss_ref, wss_ref):
    # x_ref: (TB, TK), w_ref: (TK, TO), o_ref: (TB, TO) f32 (doubles as acc)
    k = pl.program_id(2)

    @pl.when(k == 0)
    def _():
        o_ref[...] = jnp.zeros_like(o_ref)
        xss_ref[...] = jnp.zeros_like(xss_ref)
        wss_ref[...] = jnp.zeros_like(wss_ref)

    x = x_ref[...]                                             # (TB, TK) f32
    w = w_ref[...]                                             # (TK, TO) f32

    # Hot path: MXU matmul accumulated over K, directly into the output block.
    o_ref[...] += jnp.dot(x, w, preferred_element_type=jnp.float32)
    # Incremental sum-of-squares (VPU/XLU slots, hidden under MXU / DMA).
    xss_ref[...] += jnp.sum(x * x, axis=1, keepdims=True)      # (TB, 1)
    wss_ref[...] += jnp.sum(w * w, axis=0, keepdims=True)      # (1, TO)

    @pl.when(k == pl.num_programs(2) - 1)
    def _():
        # 1 / max(||v||, eps) == rsqrt(max(||v||^2, eps^2))  -- EUP, tiny.
        inv_x = lax.rsqrt(jnp.maximum(xss_ref[...], EPS * EPS))   # (TB, 1)
        inv_w = lax.rsqrt(jnp.maximum(wss_ref[...], EPS * EPS))   # (1, TO)
        o_ref[...] = (o_ref[...] * (-inv_x)) * inv_w


def cosine_layer_holy_forward(x, weight):
    """x: (B, in_dim) f32; weight: (1, in_dim, out_dim) f32 -> (B, out_dim) f32."""
    B, D = x.shape
    w2d = weight.reshape(weight.shape[1], weight.shape[2])        # (D, O)
    O = w2d.shape[1]

    B_al = _round_up(B, 8)
    D_al = _round_up(D, 128)
    O_al = _round_up(O, 128)

    # Divisor-aware, lane-dense tiles. Caps keep the double-buffered working
    # set under ~19 MiB (fits v7x's 64 MiB physical VMEM with room to spare).
    TB = _pick_tile(B, 8, 512)
    TK = _pick_tile(D, 128, 2048)
    TO = _pick_tile(O, 128, 512)

    B_pad = _round_up(B, TB)
    D_pad = _round_up(D, TK)
    O_pad = _round_up(O, TO)

    # v7x has 2 TensorCores: guarantee >=2 iterations on a parallel grid axis
    # when the data allows it. Split the axis whose re-streamed operand is
    # smaller (splitting j re-reads x, splitting i re-reads w).
    if B_pad // TB == 1 and O_pad // TO == 1:
        can_split_j = O_al >= 2 * 128
        can_split_i = B_al >= 2 * 8
        if can_split_j and (B <= O or not can_split_i):
            TO = _pick_tile(O, 128, (O_al // 2) // 128 * 128)
            O_pad = _round_up(O, TO)
        elif can_split_i:
            TB = _pick_tile(B, 8, (B_al // 2) // 8 * 8)
            B_pad = _round_up(B, TB)

    # Zero padding is exact: contributes nothing to dots or sum-of-squares;
    # padded output rows/cols are sliced off below. With divisor-aware tiles
    # these pads are no-ops for already-aligned shapes.
    if (B_pad, D_pad) != (B, D):
        x = jnp.pad(x, ((0, B_pad - B), (0, D_pad - D)))
    if (D_pad, O_pad) != (D, O):
        w2d = jnp.pad(w2d, ((0, D_pad - D), (0, O_pad - O)))

    grid = (B_pad // TB, O_pad // TO, D_pad // TK)
    n_i, n_j, n_k = grid

    # Double-buffered x/w tiles + output block + norm scratch, with headroom.
    vmem_est = 4 * (2 * TB * TK + 2 * TK * TO + 2 * TB * TO + TB + TO)
    vmem_limit = max(32 * 1024 * 1024, int(vmem_est * 1.5))

    out = pl.pallas_call(
        _cosine_kernel,
        out_shape=jax.ShapeDtypeStruct((B_pad, O_pad), jnp.float32),
        grid_spec=pltpu.PrefetchScalarGridSpec(
            num_scalar_prefetch=0,
            grid=grid,
            in_specs=[
                pl.BlockSpec((TB, TK), lambda i, j, k: (i, k)),
                # If profiling showed exposed DMA on the weight stream, a
                # pipeline_mode=pl.Buffered(3) here would be the next knob.
                pl.BlockSpec((TK, TO), lambda i, j, k: (k, j)),
            ],
            out_specs=pl.BlockSpec((TB, TO), lambda i, j, k: (i, j)),
            scratch_shapes=[
                pltpu.VMEM((TB, 1), jnp.float32),    # sum(x^2) per row
                pltpu.VMEM((1, TO), jnp.float32),    # sum(w^2) per column
            ],
        ),
        compiler_params=pltpu.CompilerParams(
            dimension_semantics=("parallel", "parallel", "arbitrary"),
            vmem_limit_bytes=vmem_limit),
        cost_estimate=pl.CostEstimate(
            flops=2 * B_pad * D_pad * O_pad,
            transcendentals=n_j * B_pad + n_i * O_pad,
            bytes_accessed=4 * (n_j * B_pad * D_pad
                                + n_i * D_pad * O_pad
                                + B_pad * O_pad)),
    )(x, w2d)

    return out[:B, :O]


def init_weight(key, in_dim, out_dim):
    # kaiming_normal_ on a (1, in_dim, out_dim) tensor:
    # fan_in = size(1) * receptive_field = in_dim * out_dim, gain = sqrt(2)
    std = (2.0 / (in_dim * out_dim)) ** 0.5
    return std * jax.random.normal(key, (1, in_dim, out_dim), dtype=jnp.float32)


def _reference(x, weight):
    w2d = weight[0]
    return -(x @ w2d) / (
        jnp.maximum(jnp.linalg.norm(x, axis=1, keepdims=True), EPS)
        * jnp.maximum(jnp.linalg.norm(w2d, axis=0, keepdims=True), EPS)
    )


if __name__ == "__main__":
    def check(B, in_dim, out_dim, key):
        k_w, k_x = jax.random.split(key)
        weight = init_weight(k_w, in_dim, out_dim)
        x = jax.random.normal(k_x, (B, in_dim), dtype=jnp.float32)

        out = jax.block_until_ready(cosine_layer_holy_forward(x, weight))
        ref = _reference(x, weight)

        assert out.shape == (B, out_dim), out.shape
        assert jnp.allclose(out, ref, atol=2e-5, rtol=1e-4), float(
            jnp.max(jnp.abs(out - ref)))

    # Small shape matching the module signature (B=2, in_dim=32, out_dim=16).
    check(2, 32, 16, jax.random.PRNGKey(0))
    # Non-power-of-two dims: divisor-aware tiling gives zero padding, and the
    # (1,1,K) -> (1,n_j,K) split path for v7x dual-TC is exercised.
    check(16, 1152, 384, jax.random.PRNGKey(1))
    # Multi-step K reduction (D > TK cap) plus the parallel-axis split.
    check(8, 2304, 256, jax.random.PRNGKey(2))

    print("KERNEL_OK")
</pallas_src>

<mosaic_0001>
module attributes {stable_mosaic.version = 11 : i64} {
  func.func @_cosine_kernel(%arg0: i32, %arg1: i32, %arg2: i32, %arg3: memref<8x128xf32, #tpu.memory_space<vmem>>, %arg4: memref<128x128xf32, #tpu.memory_space<vmem>>, %arg5: memref<8x128xf32, #tpu.memory_space<vmem>>, %arg6: memref<8x1xf32, #tpu.memory_space<vmem>>, %arg7: memref<1x128xf32, #tpu.memory_space<vmem>>) attributes {dimension_semantics = [#tpu.dimension_semantics<parallel>, #tpu.dimension_semantics<parallel>, #tpu.dimension_semantics<arbitrary>], iteration_bounds = array<i64: 1, 1, 1>, scalar_prefetch = 0 : i64, scratch_operands = 2 : i64, tpu.core_type = #tpu.core_type<tc>, window_params = [{transform_indices = @transform_0, window_bounds = array<i64: 8, 128>}, {transform_indices = @transform_1, window_bounds = array<i64: 128, 128>}, {transform_indices = @transform_2, window_bounds = array<i64: 8, 128>}]} {
    %c0_i32 = arith.constant 0 : i32
    %0 = arith.cmpi eq, %arg2, %c0_i32 : i32
    %1 = arith.extui %0 : i1 to i32
    %c0_i32_0 = arith.constant 0 : i32
    %2 = arith.cmpi ne, %1, %c0_i32_0 : i32
    scf.if %2 {
      %cst_20 = arith.constant 0.000000e+00 : f32
      %24 = vector.broadcast %cst_20 : f32 to vector<8x128xf32>
      %c0_21 = arith.constant 0 : index
      %c0_22 = arith.constant 0 : index
      %25 = vector.load %arg5[%c0_21, %c0_22] : memref<8x128xf32, #tpu.memory_space<vmem>>, vector<8x128xf32>
      tpu.vector_store %arg5[%c0_21, %c0_22], %24 {strides = array<i32>} : memref<8x128xf32, #tpu.memory_space<vmem>>, vector<8x128xf32>,
      %cst_23 = arith.constant 0.000000e+00 : f32
      %26 = vector.broadcast %cst_23 : f32 to vector<8x1xf32>
      %c0_24 = arith.constant 0 : index
      %c0_25 = arith.constant 0 : index
      %27 = vector.load %arg6[%c0_24, %c0_25] : memref<8x1xf32, #tpu.memory_space<vmem>>, vector<8x1xf32>
      tpu.vector_store %arg6[%c0_24, %c0_25], %26 {strides = array<i32>} : memref<8x1xf32, #tpu.memory_space<vmem>>, vector<8x1xf32>,
      %cst_26 = arith.constant 0.000000e+00 : f32
      %28 = vector.broadcast %cst_26 : f32 to vector<1x128xf32>
      %c0_27 = arith.constant 0 : index
      %c0_28 = arith.constant 0 : index
      %29 = vector.load %arg7[%c0_27, %c0_28] : memref<1x128xf32, #tpu.memory_space<vmem>>, vector<1x128xf32>
      tpu.vector_store %arg7[%c0_27, %c0_28], %28 {strides = array<i32>} : memref<1x128xf32, #tpu.memory_space<vmem>>, vector<1x128xf32>,
    } else {
    }
    %c0 = arith.constant 0 : index
    %c0_1 = arith.constant 0 : index
    %3 = vector.load %arg3[%c0, %c0_1] : memref<8x128xf32, #tpu.memory_space<vmem>>, vector<8x128xf32>
    %c0_2 = arith.constant 0 : index
    %c0_3 = arith.constant 0 : index
    %4 = vector.load %arg4[%c0_2, %c0_3] : memref<128x128xf32, #tpu.memory_space<vmem>>, vector<128x128xf32>
    %c0_4 = arith.constant 0 : index
    %c0_5 = arith.constant 0 : index
    %5 = vector.load %arg5[%c0_4, %c0_5] : memref<8x128xf32, #tpu.memory_space<vmem>>, vector<8x128xf32>
    %cst = arith.constant dense<0.000000e+00> : vector<8x128xf32>
    %6 = tpu.matmul %3, %4, %cst {dimension_numbers = #tpu.dot_dimension_numbers<[1], [0], [0], [1], [0, 0, 1, 1], [], []>} : vector<8x128xf32>, vector<128x128xf32>, vector<8x128xf32> -> vector<8x128xf32>
    %7 = arith.addf %5, %6 : vector<8x128xf32>
    %c0_6 = arith.constant 0 : index
    %c0_7 = arith.constant 0 : index
    %8 = vector.load %arg5[%c0_6, %c0_7] : memref<8x128xf32, #tpu.memory_space<vmem>>, vector<8x128xf32>
    tpu.vector_store %arg5[%c0_6, %c0_7], %7 {strides = array<i32>} : memref<8x128xf32, #tpu.memory_space<vmem>>, vector<8x128xf32>,
    %c0_8 = arith.constant 0 : index
    %c0_9 = arith.constant 0 : index
    %9 = vector.load %arg6[%c0_8, %c0_9] : memref<8x1xf32, #tpu.memory_space<vmem>>, vector<8x1xf32>
    %10 = arith.mulf %3, %3 : vector<8x128xf32>
    %cst_10 = arith.constant dense<0.000000e+00> : vector<8xf32>
    %11 = vector.multi_reduction <add>, %10, %cst_10 [1] : vector<8x128xf32> to vector<8xf32>
    %12 = vector.shape_cast %11 : vector<8xf32> to vector<8x1xf32>
    %13 = arith.addf %9, %12 : vector<8x1xf32>
    %c0_11 = arith.constant 0 : index
    %c0_12 = arith.constant 0 : index
    %14 = vector.load %arg6[%c0_11, %c0_12] : memref<8x1xf32, #tpu.memory_space<vmem>>, vector<8x1xf32>
    tpu.vector_store %arg6[%c0_11, %c0_12], %13 {strides = array<i32>} : memref<8x1xf32, #tpu.memory_space<vmem>>, vector<8x1xf32>,
    %c0_13 = arith.constant 0 : index
    %c0_14 = arith.constant 0 : index
    %15 = vector.load %arg7[%c0_13, %c0_14] : memref<1x128xf32, #tpu.memory_space<vmem>>, vector<1x128xf32>
    %16 = arith.mulf %4, %4 : vector<128x128xf32>
    %cst_15 = arith.constant dense<0.000000e+00> : vector<128xf32>
    %17 = vector.multi_reduction <add>, %16, %cst_15 [0] : vector<128x128xf32> to vector<128xf32>
    %18 = vector.shape_cast %17 : vector<128xf32> to vector<1x128xf32>
    %19 = arith.addf %15, %18 : vector<1x128xf32>
    %c0_16 = arith.constant 0 : index
    %c0_17 = arith.constant 0 : index
    %20 = vector.load %arg7[%c0_16, %c0_17] : memref<1x128xf32, #tpu.memory_space<vmem>>, vector<1x128xf32>
    tpu.vector_store %arg7[%c0_16, %c0_17], %19 {strides = array<i32>} : memref<1x128xf32, #tpu.memory_space<vmem>>, vector<1x128xf32>,
    %c0_i32_18 = arith.constant 0 : i32
    %21 = arith.cmpi eq, %arg2, %c0_i32_18 : i32
    %22 = arith.extui %21 : i1 to i32
    %c0_i32_19 = arith.constant 0 : i32
    %23 = arith.cmpi ne, %22, %c0_i32_19 : i32
    scf.if %23 {
      %c0_20 = arith.constant 0 : index
      %c0_21 = arith.constant 0 : index
      %24 = vector.load %arg6[%c0_20, %c0_21] : memref<8x1xf32, #tpu.memory_space<vmem>>, vector<8x1xf32>
      %cst_22 = arith.constant 1.000000e-16 : f32
      %25 = vector.broadcast %cst_22 : f32 to vector<8x1xf32>
      %26 = arith.maximumf %24, %25 : vector<8x1xf32>
      %27 = math.rsqrt %26 : vector<8x1xf32>
      %c0_23 = arith.constant 0 : index
      %c0_24 = arith.constant 0 : index
      %28 = vector.load %arg7[%c0_23, %c0_24] : memref<1x128xf32, #tpu.memory_space<vmem>>, vector<1x128xf32>
      %cst_25 = arith.constant 1.000000e-16 : f32
      %29 = vector.broadcast %cst_25 : f32 to vector<1x128xf32>
      %30 = arith.maximumf %28, %29 : vector<1x128xf32>
      %31 = math.rsqrt %30 : vector<1x128xf32>
      %c0_26 = arith.constant 0 : index
      %c0_27 = arith.constant 0 : index
      %32 = vector.load %arg5[%c0_26, %c0_27] : memref<8x128xf32, #tpu.memory_space<vmem>>, vector<8x128xf32>
      %cst_28 = arith.constant 0.000000e+00 : f32
      %33 = vector.broadcast %cst_28 : f32 to vector<8x1xf32>
      %34 = arith.subf %33, %27 : vector<8x1xf32>
      %35 = vector.broadcast %34 : vector<8x1xf32> to vector<8x128xf32>
      %36 = arith.mulf %32, %35 : vector<8x128xf32>
      %37 = vector.broadcast %31 : vector<1x128xf32> to vector<8x128xf32>
      %38 = arith.mulf %36, %37 : vector<8x128xf32>
      %c0_29 = arith.constant 0 : index
      %c0_30 = arith.constant 0 : index
      %39 = vector.load %arg5[%c0_29, %c0_30] : memref<8x128xf32, #tpu.memory_space<vmem>>, vector<8x128xf32>
      tpu.vector_store %arg5[%c0_29, %c0_30], %38 {strides = array<i32>} : memref<8x128xf32, #tpu.memory_space<vmem>>, vector<8x128xf32>,
    } else {
    }
    return
  }
  func.func @transform_0(%arg0: i32, %arg1: i32, %arg2: i32) -> (i32, i32) {
    %c0_i32 = arith.constant 0 : i32
    return %arg0, %arg2 : i32, i32
  }
  func.func @transform_1(%arg0: i32, %arg1: i32, %arg2: i32) -> (i32, i32) {
    %c0_i32 = arith.constant 0 : i32
    return %arg2, %arg1 : i32, i32
  }
  func.func @transform_2(%arg0: i32, %arg1: i32, %arg2: i32) -> (i32, i32) {
    %c0_i32 = arith.constant 0 : i32
    return %arg0, %arg1 : i32, i32
  }
}

</mosaic_0001>

<bundles_post_ra>
// kernel: tpu_custom_call.1
= control target key start
LH: loop header
LB: loop body
LE: loop exit
PB: predicated region body
PF: predicated region fallthrough
CT: control target
= control target key end

     0   :  { %7 = vsyncpa [#allocation5], 0  ;;  %s433_s0 = inlined_call_operand.hbm [shape: f32[8,128], index: 0, kind: input, shape index: {}]   ;;  %s434_s1 = inlined_call_operand.hbm [shape: f32[128,128], index: 1, kind: input, shape index: {}]   ;;  %s435_s2 = inlined_call_operand.hbm [shape: f32[8,128], index: 2, kind: output, shape index: {}]  }
   0x1   :  { %8 = vsyncpa [#allocation8], 0 }
   0x2   :  { %9 = vsyncpa [#allocation6], 0  ;;  %s355_s9 = smov [#allocation4]   ;;  %s356_s11 = smov [#allocation7]  }
   0x3   :  { %s16_s10 = sshll.u32 %s355_s9, 4  ;;  %s25_s12 = sshll.u32 %s356_s11, 4  ;;  %s17_s10 = int_to_ptr.vmem [resolvable:$true] %s16_s10  ;;  %s26_s12 = int_to_ptr.vmem [resolvable:$true] %s25_s12 }
   0x4   :  { %s297_s13 = scalar_lea.vmem %s17_s10, 128  ;;  %p302_p1 = scmp.lt.s32.totalorder %s17_s10, %s17_s10 }
   0x5   :  { %p298_p0 = scmp.ne.s32.totalorder %s17_s10, %s297_s13  ;;  %p303_p2 = scmp.lt.s32.totalorder %s297_s13, %s297_s13 }
   0x7   :  { %p304_p3 = por %p303_p2, %p302_p1 }
   0x9   :  { %p305_p4 = pnand %p304_p3, %p298_p0 }
   0xb   :  { %308 = shalt.err (!%p305_p4)
}
   0xc   :  { %19 = dma.hbm_to_vmem [thread:$0]  %s433_s0, 128, %s17_s10, [#allocation5]  }
   0xd   :  { %s317_s16 = scalar_lea.vmem %s26_s12, 2048  ;;  %p322_p6 = scmp.lt.s32.totalorder %s26_s12, %s26_s12 }
   0xe   :  { %p318_p5 = scmp.ne.s32.totalorder %s26_s12, %s317_s16  ;;  %p323_p7 = scmp.lt.s32.totalorder %s317_s16, %s317_s16 }
  0x10   :  { %p324_p8 = por %p323_p7, %p322_p6 }
  0x12   :  { %p325_p9 = pnand %p324_p8, %p318_p5 }
  0x14   :  { %328 = shalt.err (!%p325_p9)
}
  0x15   :  { %s357_s17 = smov 128   ;;  %s358_s18 = smov 8  }
  0x16   :  { %31 = dma.hbm_to_vmem [thread:$0]  %s434_s1, 2048, %s26_s12, [#allocation8], %s357_s17, %s357_s17, %s358_s18  }
  0x17   :  { %349 = dma.done.wait [#allocation5], 128  }
  0x18   :  { %350 = vsyncadd [#allocation5], 4294967168 }
  0x19   :  { %351 = dma.done.wait [#allocation8], 2048  }
  0x1a   :  { %352 = vsyncadd [#allocation8], 4294965248  ;;  %vm43_vm0 = vcmask 7168   ;;  %v359_v0 = vmov 0.0   ;;  %vm360_vm1 = vmmov 0   ;;  %v389_v1 = vld [vmem:[#allocation4] sm:$0xff] }
  0x1b   :  { %241 = vmatprep.subr.mxu0 %v359_v0  ;;  %45 = vst [vmem:[#allocation3] sm:$0x1] %v359_v0  ;;  %273 = vmatprep.mubr.msk.f32.mxu0 %vm360_vm1, %v359_v0  ;;  %44 = vst.msk [vmem:[#allocation2] sm:$0xff] %vm43_vm0, %v359_v0  ;;  %v391_v2 = vld [vmem:[#allocation7 + $0x78] sm:$0xff]  ;;  %v393_v3 = vld [vmem:[#allocation7 + $0x70] sm:$0xff]  ;;  %v137_v4 = vmul.f32 %v389_v1, %v389_v1  ;;  %v361_v32 = vmov 0  }
  0x1c   :  { %242 = vmatpush3.msra.mxu0 %v391_v2  ;;  %v399_v5 = vld [vmem:[#allocation7 + $0x68] sm:$0xff]  ;;  %v59_v6 = vld [vmem:[#allocation7 + $0x60] sm:$0xff]  ;;  %v49_v9 = vld [vmem:[#allocation7 + $0x10] sm:$0xff]  ;;  %284 = vset.pattern.permute.xlu0 %v361_v32  ;;  %v158_v45 = vmul.f32 %v393_v3, %v393_v3  ;;  %v159_v47 = vmul.f32 %v391_v2, %v391_v2  ;;  %s362_s0 = smov [#allocation9]  }
  0x1d   :  { %243 = vmatprep.subr.mxu0 %v359_v0  ;;  %138 = vadd.xlane.f32.xlu0 %v137_v4  ;;  %v403_v7 = vld [vmem:[#allocation7] sm:$0xff]  ;;  %v48_v8 = vld [vmem:[#allocation7 + $0x8] sm:$0xff]  ;;  %v58_v11 = vld [vmem:[#allocation7 + $0x58] sm:$0xff]  ;;  %v146_v13 = vmul.f32 %v49_v9, %v49_v9  ;;  %v156_v41 = vmul.f32 %v59_v6, %v59_v6  ;;  %v157_v43 = vmul.f32 %v399_v5, %v399_v5  ;;  %s214_s1 = sshll.u32 %s362_s0, 4  ;;  %s215_s1 = int_to_ptr.vmem [resolvable:$true] %s214_s1 }
  0x1e   :  { %244 = vmatpush3.msra.mxu0 %v393_v3  ;;  %v144_v10 = vmul.f32 %v403_v7, %v403_v7  ;;  %v145_v12 = vmul.f32 %v48_v8, %v48_v8  ;;  %v50_v14 = vld [vmem:[#allocation7 + $0x18] sm:$0xff]  ;;  %v57_v15 = vld [vmem:[#allocation7 + $0x50] sm:$0xff]  ;;  %v51_v18 = vld [vmem:[#allocation7 + $0x20] sm:$0xff]  ;;  %v155_v39 = vmul.f32 %v58_v11, %v58_v11  ;;  %s329_s21 = scalar_lea.vmem %s215_s1, 128  ;;  %p334_p11 = scmp.lt.s32.totalorder %s215_s1, %s215_s1 }
  0x1f   :  { %245 = vmatprep.subr.mxu0 %v359_v0  ;;  %v147_v16 = vmul.f32 %v50_v14, %v50_v14  ;;  %v56_v19 = vld [vmem:[#allocation7 + $0x48] sm:$0xff]  ;;  %v148_v20 = vmul.f32 %v51_v18, %v51_v18  ;;  %v55_v23 = vld [vmem:[#allocation7 + $0x40] sm:$0xff]  ;;  %v53_v26 = vld [vmem:[#allocation7 + $0x30] sm:$0xff]  ;;  %v154_v37 = vmul.f32 %v57_v15, %v57_v15  ;;  %p330_p10 = scmp.ne.s32.totalorder %s215_s1, %s329_s21  ;;  %p335_p12 = scmp.lt.s32.totalorder %s329_s21, %s329_s21 }
  0x20   :  { %246 = vmatpush3.msra.mxu0 %v399_v5  ;;  %v160_v17 = vadd.f32 %v145_v12, %v144_v10  ;;  %v52_v22 = vld [vmem:[#allocation7 + $0x28] sm:$0xff]  ;;  %v54_v27 = vld [vmem:[#allocation7 + $0x38] sm:$0xff]  ;;  %v150_v28 = vmul.f32 %v53_v26, %v53_v26  ;;  %v152_v33 = vmul.f32 %v55_v23, %v55_v23  ;;  %v153_v35 = vmul.f32 %v56_v19, %v56_v19 }
  0x21   :  { %247 = vmatprep.subr.mxu0 %v359_v0  ;;  %v149_v24 = vmul.f32 %v52_v22, %v52_v22  ;;  %v151_v30 = vmul.f32 %v54_v27, %v54_v27  ;;  %p336_p13 = por %p335_p12, %p334_p11 }
  0x22   :  { %248 = vmatpush3.msra.mxu0 %v59_v6  ;;  %v161_v21 = vadd.f32 %v160_v17, %v146_v13  ;;  %v143_v56 = vld [vmem:[#allocation3] sm:$0x1]  ;;  %v136_v59 = vld [vmem:[#allocation2] sm:$0xff]  ;;  %v201_v6 = vlaneseq }
  0x23   :  { %249 = vmatprep.subr.mxu0 %v359_v0  ;;  %p337_p0 = pnand %p336_p13, %p330_p10 }
  0x24   :  { %250 = vmatpush3.msra.mxu0 %v58_v11  ;;  %v162_v25 = vadd.f32 %v161_v21, %v147_v16 }
  0x25   :  { %251 = vmatprep.subr.mxu0 %v359_v0 }
  0x26   :  { %252 = vmatpush3.msra.mxu0 %v57_v15  ;;  %v163_v29 = vadd.f32 %v162_v25, %v148_v20 }
  0x27   :  { %253 = vmatprep.subr.mxu0 %v359_v0 }
  0x28   :  { %254 = vmatpush3.msra.mxu0 %v56_v19  ;;  %v164_v31 = vadd.f32 %v163_v29, %v149_v24 }
  0x29   :  { %255 = vmatprep.subr.mxu0 %v359_v0 }
  0x2a   :  { %256 = vmatpush3.msra.mxu0 %v55_v23  ;;  %v165_v34 = vadd.f32 %v164_v31, %v150_v28 }
  0x2b   :  { %257 = vmatprep.subr.mxu0 %v359_v0 }
  0x2c   :  { %258 = vmatpush3.msra.mxu0 %v54_v27  ;;  %v166_v36 = vadd.f32 %v165_v34, %v151_v30 }
  0x2d   :  { %259 = vmatprep.subr.mxu0 %v359_v0 }
  0x2e   :  { %260 = vmatpush3.msra.mxu0 %v53_v26  ;;  %v167_v38 = vadd.f32 %v166_v36, %v152_v33 }
  0x2f   :  { %261 = vmatprep.subr.mxu0 %v359_v0 }
  0x30   :  { %262 = vmatpush3.msra.mxu0 %v52_v22  ;;  %v168_v40 = vadd.f32 %v167_v38, %v153_v35 }
  0x31   :  { %263 = vmatprep.subr.mxu0 %v359_v0 }
  0x32   :  { %264 = vmatpush3.msra.mxu0 %v51_v18  ;;  %v169_v42 = vadd.f32 %v168_v40, %v154_v37 }
  0x33   :  { %265 = vmatprep.subr.mxu0 %v359_v0 }
  0x34   :  { %266 = vmatpush3.msra.mxu0 %v50_v14  ;;  %v170_v44 = vadd.f32 %v169_v42, %v155_v39 }
  0x35   :  { %267 = vmatprep.subr.mxu0 %v359_v0 }
  0x36   :  { %268 = vmatpush3.msra.mxu0 %v49_v9  ;;  %v171_v46 = vadd.f32 %v170_v44, %v156_v41 }
  0x37   :  { %269 = vmatprep.subr.mxu0 %v359_v0 }
  0x38   :  { %270 = vmatpush3.msra.mxu0 %v48_v8  ;;  %v172_v48 = vadd.f32 %v171_v46, %v157_v43 }
  0x39   :  { %271 = vmatprep.subr.mxu0 %v359_v0 }
  0x3a   :  { %272 = vmatpush3.msra.mxu0 %v403_v7  ;;  %v173_v49 = vadd.f32 %v172_v48, %v158_v45  ;;  %v202_v7 = vshrl.u32 %v201_v6, 7 }
  0x3b   :  { %274 = vmatmul.mubr.f32.vlgmr.msra.gmra.mxu0 %v389_v1 }
  0x3c   :  { %v174_v50 = vadd.f32 %v173_v49, %v159_v47  ;;  %v203_v8 = vsub.s32 0, %v202_v7 }
  0x3e   :  { %v175_v51 = vrot.slane %v174_v50, 4 }
  0x40   :  { %v176_v52 = vadd.f32 %v175_v51, %v174_v50 }
  0x42   :  { %v177_v53 = vrot.slane %v176_v52, 2 }
  0x44   :  { %v178_v54 = vadd.f32 %v177_v53, %v176_v52 }
  0x46   :  { %v179_v55 = vrot.slane %v178_v54, 1 }
  0x48   :  { %v180_v57 = vadd.f32 %v179_v55, %v178_v54 }
  0x4a   :  { %v181_v58 = vadd.f32 %v180_v57, %v143_v56 }
  0x4c   :  { %182 = vst [vmem:[#allocation3] sm:$0x1] %v181_v58 }
  0x53   :  { %v189_v4 = vld [vmem:[#allocation3] sm:$0x1] }
  0x54   :  { %v190_v5 = vmax.f32 %v189_v4, 1e-16 }
  0xa6   :  { %v139_v60 = vpop.xlane.xlu0 %138 }
  0xa7   :  { %v140_v61 = vadd.f32 %v139_v60, %v136_v59 }
  0xa9   :  { %142 = vst.msk [vmem:[#allocation2] sm:$0xff] %vm43_vm0, %v140_v61 }
  0xb0   :  { %v186_v62 = vld [vmem:[#allocation2] sm:$0xff] }
  0xb1   :  { %v187_v63 = vmax.f32 %v186_v62, 1e-16 }
  0xb3   :  { %285 = vrsqrt.f32 %v187_v63 }
  0xb4   :  { %287 = vrsqrt.f32 %v190_v5 }
  0xc0   :  { %v286_v0 = vpop.eup %285 }
  0xc1   :  { %v193_v1 = vsub.f32 0.0, %v286_v0  ;;  %v288_v9 = vpop.eup %287 }
  0xc2   :  { %v204_v10 = vrot.slane %v288_v9, %v203_v8 }
  0xc3   :  { %196 = vperm.xlu0 %284, %v193_v1  }
  0xfb   :  { %v130_v2 = vpop.f32.mrf.mxu0 }
  0xfd   :  { %v275_v3 = vpop.f32.mrf.mxu0 }
 0x13e   :  { %v197_v11 = vpop.permute.xlu0 %196 }
 0x13f   :  { %v199_v12 = vmul.f32 %v197_v11, %v130_v2 }
 0x141   :  { %v206_v13 = vmul.f32 %v204_v10, %v199_v12 }
 0x143   :  { %207 = vst [vmem:[#allocation9] sm:$0xff] %v206_v13 }
 0x144   :  { %340 = shalt.err (!%p337_p0)
}
 0x145   :  { %217 = dma.vmem_to_hbm [thread:$0]  %s215_s1, 128, %s435_s2, [#allocation6]  }
 0x146   :  { %353 = dma.done.wait [#allocation6], 128  }
 0x147   :  { %354 = vsyncadd [#allocation6], 4294967168 }
 0x148   :  { %221 = vsyncpa [#allocation5], 1 }
 0x149   :  { %222 = vsyncpa [#allocation8], 1 }
 0x14a   :  { %223 = vsyncpa [#allocation6], 1 }

</bundles_post_ra>
